<compile_context>
chip_gen: v5e
topology: v5e:2x2
jax: 0.10.0
libtpu: 0.0.40
codegen_flags: <defaults>
</compile_context>

<pallas_src>
import functools

import jax
import jax.numpy as jnp
from jax.experimental import pallas as pl
from jax.experimental.pallas import tpu as pltpu


def _cdiv(a, b):
    return (a + b - 1) // b


def _round_up(a, b):
    return _cdiv(a, b) * b


def _distortion_kernel(w_ref, z_ref, nf_ref, out_ref):
    # Rays on lanes (last axis), samples on sublanes. Accumulate in f32.
    w = w_ref[...].astype(jnp.float32)          # [N,   TR]
    z = z_ref[...].astype(jnp.float32)          # [N+1, TR]
    nf = nf_ref[...].astype(jnp.float32)        # [2,   TR]
    near = nf[0:1, :]                           # [1,   TR]
    far = nf[1:2, :]                            # [1,   TR]

    n = w.shape[0]

    # One reciprocal per ray instead of N+1 vector divides (exact, not approx,
    # to keep the 1e-5 self-check tight).
    inv = pl.reciprocal(far - near, approx=False)        # [1, TR]

    # Go straight from the two shifted z views; never materialize bins[N+1,TR].
    z_lo = z[:-1, :]                                     # [N, TR]
    z_hi = z[1:, :]                                      # [N, TR]
    delta = (z_hi - z_lo) * inv                          # ends - starts, [N, TR]
    mid = (0.5 * (z_hi + z_lo) - near) * inv             # midpoints,     [N, TR]

    # Exclusive prefix sums via two small shared strictly-lower-triangular
    # [N,N] x [N,TR] MXU matmuls -> O(N*TR) memory, no [TR,N,N] intermediate.
    row = jax.lax.broadcasted_iota(jnp.int32, (n, n), 0)
    col = jax.lax.broadcasted_iota(jnp.int32, (n, n), 1)
    ltri = (col < row).astype(jnp.float32)               # ones strictly below diag
    cw = jnp.dot(ltri, w, preferred_element_type=jnp.float32)          # A_i  [N, TR]
    cwm = jnp.dot(ltri, w * mid, preferred_element_type=jnp.float32)   # B_i  [N, TR]

    # Single fused sublane reduction for pair + intra terms:
    #   L = sum_i w_i * ( 2*(m_i*A_i - B_i) + (1/3)*w_i*(e_i - s_i) )
    loss = jnp.sum(
        w * (2.0 * (mid * cw - cwm) + (1.0 / 3.0) * (w * delta)),
        axis=0, keepdims=True,
    )                                                    # [1, TR]

    out_ref[...] = loss.astype(out_ref.dtype)            # lane-dense [1, TR] store


def distortion_loss_samples_major(wT, zT, nfT, out_dtype, *, ray_tile=8192):
    """Core entry: samples-major inputs, rays already padded to a tile multiple.
    wT: [N, R_pad], zT: [N+1, R_pad], nfT: [2, R_pad] (near row 0, far row 1).
    Returns [1, R_pad]."""
    N, R_pad = wT.shape
    assert zT.shape == (N + 1, R_pad) and nfT.shape == (2, R_pad)
    tr = int(ray_tile)
    assert tr % 128 == 0 and R_pad % tr == 0

    # VMEM budget: double-buffered I/O blocks + generous allowance for the live
    # [N, tr] f32 intermediates in the body. Capped below physical VMEM.
    io_bytes = (N + (N + 1) + 2 + 1) * tr * 4
    temp_bytes = 12 * N * tr * 4
    vmem_limit = min(2 * io_bytes + temp_bytes + (4 << 20), 96 << 20)
    # TODO(synk): on v7x (64 MiB physical VMEM) re-derive the cap if ray_tile or N
    # is pushed far beyond the defaults.

    return pl.pallas_call(
        _distortion_kernel,
        out_shape=jax.ShapeDtypeStruct((1, R_pad), out_dtype),
        grid_spec=pltpu.PrefetchScalarGridSpec(
            num_scalar_prefetch=0,
            grid=(R_pad // tr,),
            in_specs=[
                pl.BlockSpec((N, tr), lambda i: (0, i)),
                pl.BlockSpec((N + 1, tr), lambda i: (0, i)),
                pl.BlockSpec((2, tr), lambda i: (0, i)),
            ],
            out_specs=pl.BlockSpec((1, tr), lambda i: (0, i)),
        ),
        compiler_params=pltpu.CompilerParams(
            dimension_semantics=("parallel",),   # shards the ray grid across v7x's 2 TCs
            vmem_limit_bytes=int(vmem_limit),
        ),
    )(wT, zT, nfT)


def distortion_loss(weights, z_vals, near, far, *, is_mip=True, ray_tile=8192):
    """weights: [R, N, 1], z_vals: [R, N+1] (is_mip=True) or [R, N] (is_mip=False),
    near/far: [R, 1].  Returns [R, 1] (same semantics as the PyTorch module).
    ray_tile: max lanes per grid step (multiple of 128); 8192 is a good default on
    v5e/v6e, 16384-32768 on v7x."""
    if not is_mip:
        # glue: convert sample locations to bin edges (exactly as the PyTorch branch)
        zb = 0.5 * (z_vals[..., :-1] + z_vals[..., 1:])
        z_vals = jnp.concatenate(
            (2.0 * z_vals[..., 0:1] - zb[..., 0:1],
             zb,
             2.0 * z_vals[..., -1:] - zb[..., -1:]),
            axis=-1,
        )

    w2d = weights[..., 0]                    # [R, N]
    R, N = w2d.shape
    assert z_vals.shape[-1] == N + 1, \
        "z_vals must have one more entry than weights along the sample axis"

    # --- balanced ray tiling -------------------------------------------------
    tr_max = int(ray_tile)
    assert tr_max % 128 == 0, "ray_tile must be a multiple of 128 lanes"
    num_tiles = _cdiv(R, tr_max)
    # Keep >=2 grid steps when there are enough rays so v7x's 2 TCs both work.
    if num_tiles < 2 and _cdiv(R, 128) >= 2:
        num_tiles = 2
    tr = _round_up(_cdiv(R, num_tiles), 128)
    R_pad = num_tiles * tr
    pad = R_pad - R

    # --- relayout to samples-major (one transpose + one pad per large array;
    #     XLA fuses these into a single copy under jit; callers with samples-major
    #     data should call distortion_loss_samples_major directly) --------------
    wT = jnp.transpose(w2d)                  # [N,   R]
    zT = jnp.transpose(z_vals)               # [N+1, R]
    nT = jnp.reshape(near, (1, R))
    fT = jnp.reshape(far, (1, R))
    if pad:
        wT = jnp.pad(wT, ((0, 0), (0, pad)))                       # zero weights -> zero loss
        zT = jnp.pad(zT, ((0, 0), (0, pad)))
        nT = jnp.pad(nT, ((0, 0), (0, pad)))
        fT = jnp.pad(fT, ((0, 0), (0, pad)), constant_values=1.0)  # far-near=1 on padding
    nfT = jnp.concatenate([nT, fT], axis=0)  # [2, R_pad]

    out = distortion_loss_samples_major(wT, zT, nfT, weights.dtype, ray_tile=tr)
    return jnp.transpose(out[:, :R])         # [R, 1]


def _distortion_loss_ref(weights, z_vals, near, far, is_mip=True):
    """Plain-JAX transliteration of the PyTorch forward (for silent correctness check)."""
    if not is_mip:
        zb = 0.5 * (z_vals[..., :-1] + z_vals[..., 1:])
        z_vals = jnp.concatenate(
            (2.0 * z_vals[..., 0:1] - zb[..., 0:1], zb,
             2.0 * z_vals[..., -1:] - zb[..., -1:]), axis=-1)
    bins = (z_vals - near) / (far - near)
    starts = bins[..., :-1, None]
    ends = bins[..., 1:, None]
    midpoints = (starts + ends) / 2.0
    loss = weights * weights[..., None, :, 0] * jnp.abs(midpoints - midpoints[..., None, :, 0])
    loss = jnp.sum(loss, axis=(-1, -2))[..., None]
    loss = loss + (1.0 / 3.0) * jnp.sum(weights ** 2 * (ends - starts), axis=-2)
    return loss


if __name__ == "__main__":
    key = jax.random.PRNGKey(0)
    k1, k2 = jax.random.split(key, 2)

    R, N = 300, 16  # rays, samples per ray (R=300 exercises balanced tiling + padding)

    # weights: [R, N, 1], non-negative and roughly normalized (like rendering weights)
    raw = jax.random.uniform(k1, (R, N), dtype=jnp.float32)
    weights = (raw / jnp.sum(raw, axis=-1, keepdims=True))[..., None]

    # per-ray near/far and monotonically increasing z_vals in [near, far]: [R, N+1]
    near = jnp.full((R, 1), 2.0, dtype=jnp.float32)
    far = jnp.full((R, 1), 6.0, dtype=jnp.float32)
    dz = jax.random.uniform(k2, (R, N + 1), dtype=jnp.float32, minval=0.1, maxval=1.0)
    z_vals = near + (far - near) * jnp.cumsum(dz, axis=-1) / jnp.sum(dz, axis=-1, keepdims=True)

    # jit the end-to-end wrapper so the relayout (transpose+pad) fuses with the
    # kernel's HBM traffic. At this demo scale the balanced tiling gives a 2-step
    # grid with tr=256.
    fn = jax.jit(functools.partial(distortion_loss, is_mip=True, ray_tile=8192))
    out = jax.block_until_ready(fn(weights, z_vals, near, far))

    ref = _distortion_loss_ref(weights, z_vals, near, far, is_mip=True)
    assert out.shape == (R, 1)
    assert bool(jnp.allclose(out, ref, atol=1e-5, rtol=1e-5))

    print("KERNEL_OK")
</pallas_src>

<mosaic_0001>
module attributes {stable_mosaic.version = 11 : i64} {
  func.func @_distortion_kernel(%arg0: i32, %arg1: memref<16x256xf32, #tpu.memory_space<vmem>>, %arg2: memref<17x256xf32, #tpu.memory_space<vmem>>, %arg3: memref<2x256xf32, #tpu.memory_space<vmem>>, %arg4: memref<1x256xf32, #tpu.memory_space<vmem>>) attributes {dimension_semantics = [#tpu.dimension_semantics<parallel>], iteration_bounds = array<i64: 2>, scalar_prefetch = 0 : i64, scratch_operands = 0 : i64, tpu.core_type = #tpu.core_type<tc>, window_params = [{transform_indices = @transform_0, window_bounds = array<i64: 16, 256>}, {transform_indices = @transform_1, window_bounds = array<i64: 17, 256>}, {transform_indices = @transform_2, window_bounds = array<i64: 2, 256>}, {transform_indices = @transform_3, window_bounds = array<i64: 1, 256>}]} {
    %c0 = arith.constant 0 : index
    %c0_0 = arith.constant 0 : index
    %0 = vector.load %arg1[%c0, %c0_0] : memref<16x256xf32, #tpu.memory_space<vmem>>, vector<16x256xf32>
    %c0_1 = arith.constant 0 : index
    %c0_2 = arith.constant 0 : index
    %1 = vector.load %arg2[%c0_1, %c0_2] : memref<17x256xf32, #tpu.memory_space<vmem>>, vector<17x256xf32>
    %c0_3 = arith.constant 0 : index
    %c0_4 = arith.constant 0 : index
    %2 = vector.load %arg3[%c0_3, %c0_4] : memref<2x256xf32, #tpu.memory_space<vmem>>, vector<2x256xf32>
    %3 = vector.extract_strided_slice %2 {offsets = [0, 0], sizes = [1, 256], strides = [1, 1]} : vector<2x256xf32> to vector<1x256xf32>
    %4 = vector.extract_strided_slice %2 {offsets = [1, 0], sizes = [1, 256], strides = [1, 1]} : vector<2x256xf32> to vector<1x256xf32>
    %5 = arith.subf %4, %3 : vector<1x256xf32>
    %6 = tpu.reciprocal %5 : vector<1x256xf32> -> vector<1x256xf32>
    %7 = vector.extract_strided_slice %1 {offsets = [0, 0], sizes = [16, 256], strides = [1, 1]} : vector<17x256xf32> to vector<16x256xf32>
    %8 = vector.extract_strided_slice %1 {offsets = [1, 0], sizes = [16, 256], strides = [1, 1]} : vector<17x256xf32> to vector<16x256xf32>
    %9 = arith.subf %8, %7 : vector<16x256xf32>
    %10 = vector.broadcast %6 : vector<1x256xf32> to vector<16x256xf32>
    %11 = arith.mulf %9, %10 : vector<16x256xf32>
    %12 = arith.addf %8, %7 : vector<16x256xf32>
    %cst = arith.constant 5.000000e-01 : f32
    %13 = vector.broadcast %cst : f32 to vector<16x256xf32>
    %14 = arith.mulf %13, %12 : vector<16x256xf32>
    %15 = vector.broadcast %3 : vector<1x256xf32> to vector<16x256xf32>
    %16 = arith.subf %14, %15 : vector<16x256xf32>
    %17 = vector.broadcast %6 : vector<1x256xf32> to vector<16x256xf32>
    %18 = arith.mulf %16, %17 : vector<16x256xf32>
    %19 = tpu.iota {dimensions = array<i32: 0>} : vector<16x16xi32>
    %20 = tpu.iota {dimensions = array<i32: 1>} : vector<16x16xi32>
    %21 = arith.cmpi slt, %20, %19 : vector<16x16xi32>
    %22 = arith.extui %21 : vector<16x16xi1> to vector<16x16xi32>
    %23 = arith.sitofp %22 : vector<16x16xi32> to vector<16x16xf32>
    %cst_5 = arith.constant dense<0.000000e+00> : vector<16x256xf32>
    %24 = tpu.matmul %23, %0, %cst_5 {dimension_numbers = #tpu.dot_dimension_numbers<[1], [0], [0], [1], [0, 0, 1, 1], [], []>} : vector<16x16xf32>, vector<16x256xf32>, vector<16x256xf32> -> vector<16x256xf32>
    %25 = arith.mulf %0, %18 : vector<16x256xf32>
    %cst_6 = arith.constant dense<0.000000e+00> : vector<16x256xf32>
    %26 = tpu.matmul %23, %25, %cst_6 {dimension_numbers = #tpu.dot_dimension_numbers<[1], [0], [0], [1], [0, 0, 1, 1], [], []>} : vector<16x16xf32>, vector<16x256xf32>, vector<16x256xf32> -> vector<16x256xf32>
    %27 = arith.mulf %18, %24 : vector<16x256xf32>
    %28 = arith.subf %27, %26 : vector<16x256xf32>
    %cst_7 = arith.constant 2.000000e+00 : f32
    %29 = vector.broadcast %cst_7 : f32 to vector<16x256xf32>
    %30 = arith.mulf %29, %28 : vector<16x256xf32>
    %31 = arith.mulf %0, %11 : vector<16x256xf32>
    %cst_8 = arith.constant 0.333333343 : f32
    %32 = vector.broadcast %cst_8 : f32 to vector<16x256xf32>
    %33 = arith.mulf %32, %31 : vector<16x256xf32>
    %34 = arith.addf %30, %33 : vector<16x256xf32>
    %35 = arith.mulf %0, %34 : vector<16x256xf32>
    %cst_9 = arith.constant dense<0.000000e+00> : vector<256xf32>
    %36 = vector.multi_reduction <add>, %35, %cst_9 [0] : vector<16x256xf32> to vector<256xf32>
    %37 = vector.shape_cast %36 : vector<256xf32> to vector<1x256xf32>
    %c0_10 = arith.constant 0 : index
    %c0_11 = arith.constant 0 : index
    %38 = vector.load %arg4[%c0_10, %c0_11] : memref<1x256xf32, #tpu.memory_space<vmem>>, vector<1x256xf32>
    tpu.vector_store %arg4[%c0_10, %c0_11], %37 {strides = array<i32>} : memref<1x256xf32, #tpu.memory_space<vmem>>, vector<1x256xf32>,
    return
  }
  func.func @transform_0(%arg0: i32) -> (i32, i32) {
    %c0_i32 = arith.constant 0 : i32
    %c0_i32_0 = arith.constant 0 : i32
    return %c0_i32, %arg0 : i32, i32
  }
  func.func @transform_1(%arg0: i32) -> (i32, i32) {
    %c0_i32 = arith.constant 0 : i32
    %c0_i32_0 = arith.constant 0 : i32
    return %c0_i32, %arg0 : i32, i32
  }
  func.func @transform_2(%arg0: i32) -> (i32, i32) {
    %c0_i32 = arith.constant 0 : i32
    %c0_i32_0 = arith.constant 0 : i32
    return %c0_i32, %arg0 : i32, i32
  }
  func.func @transform_3(%arg0: i32) -> (i32, i32) {
    %c0_i32 = arith.constant 0 : i32
    %c0_i32_0 = arith.constant 0 : i32
    return %c0_i32, %arg0 : i32, i32
  }
}

</mosaic_0001>

<bundles_post_ra>
// kernel: distortion_loss.1
= control target key start
LH: loop header
LB: loop body
LE: loop exit
PB: predicated region body
PF: predicated region fallthrough
CT: control target
= control target key end

     0   :  { %s836_s12 = smov 0   ;;  %s838_s13 = smov 0   ;;  %s1061_s0 = inlined_call_operand.vmem [shape: f32[16,512], index: 0, kind: input, shape index: {}]   ;;  %s1062_s1 = inlined_call_operand.vmem [shape: f32[17,512], index: 1, kind: input, shape index: {}]   ;;  %s1063_s2 = inlined_call_operand.vmem [shape: f32[2,512], index: 2, kind: input, shape index: {}]   ;;  %s1064_s3 = inlined_call_operand.vmem [shape: f32[1,512], index: 3, kind: output, shape index: {}]  }
   0x1   :  { %s840_s14 = smov 0  }
   0x2 LB: > { %s734_s15 = sadd.s32 4294967295, %s813_s14   ;;  %s853_s16 = sadd.s32 1, %s813_s14   ;;  %s813_s14 = sphi %s840_s14, %s1068_s14   ;;  %s809_s13 = sphi %s838_s13, %s1067_s13   ;;  %s805_s12 = sphi %s836_s12, %s1066_s12  }
   0x3   : > { %s17_s17 = ssub.s32 %s813_s14, %s853_s16  ;;  %s20_s18 = sadd.s32 1, %s809_s13 }
   0x4   : > { %p18_p0 = scmp.eq.s32.totalorder %s17_s17, 0  ;;  %p27_p1 = scmp.ne.s32.totalorder %s809_s13, %s805_s12 }
   0x5   : > { %p28_p2 = scmp.eq.s32.totalorder %s813_s14, 0  ;;  %p737_p4 = scmp.ge.s32.totalorder %s813_s14, 2 }
   0x6   : > { %s862_s19 = scalar_select %p18_p0, %s809_s13, %s20_s18  }
   0x7   : > { %p864_p3 = por %p28_p2, %p27_p1  ;;  %131 = sbr.rel (%p737_p4) target bundleno = 30 (0x1e), region = 16 }
   0xc   : > { %134 = sbr.rel (!%p864_p3) target bundleno = 20 (0x14), region = 20  ;;  %s136_s21 = sand.u32 (%p864_p3), 1, %s809_s13  }
   0xd   : > { %s760_s22 = sshll.u32 (%p864_p3), %s813_s14, 4  ;;  %s738_s23 = sshll.u32 (%p864_p3), %s136_s21, 5 }
   0xe   : > { %s141_s26 = scalar_lea.vmem (%p864_p3), %s1061_s0, %s760_s22  ;;  %s138_s27 = scalar_lea.vmem (%p864_p3), [#allocation2], %s738_s23 }
   0xf   : > { %v154_v0 = vld [vmem:[%s141_s26] sm:$0xff] (%p864_p3)  ;;  %v156_v1 = vld [vmem:[%s141_s26 + $0x8] sm:$0xff] (%p864_p3) }
  0x10   : > { %v158_v2 = vld [vmem:[%s141_s26 + $0x20] sm:$0xff] (%p864_p3)  ;;  %155 = vst [vmem:[%s138_s27] sm:$0xff] (%p864_p3), %v154_v0  ;;  %v160_v3 = vld [vmem:[%s141_s26 + $0x28] sm:$0xff] (%p864_p3) }
  0x11   : > { %157 = vst [vmem:[%s138_s27 + $0x8] sm:$0xff] %v156_v1 }
  0x12   : > { %159 = vst [vmem:[%s138_s27 + $0x10] sm:$0xff] %v158_v2 }
  0x13   : > { %161 = vst [vmem:[%s138_s27 + $0x18] sm:$0xff] %v160_v3 }
  0x14 PF: > { %167 = sbr.rel (!%p864_p3) target bundleno = 30 (0x1e), region = 43  ;;  %s169_s28 = sand.u32 (%p864_p3), 1, %s809_s13  }
  0x15   : > { %s761_s29 = sshll.u32 (%p864_p3), %s813_s14, 4  ;;  %s762_s30 = smul.u32 (%p864_p3), 48, %s169_s28 }
  0x16   : > { %s174_s6 = scalar_lea.vmem (%p864_p3), %s1062_s1, %s761_s29 }
  0x17   : > { %v187_v4 = vld [vmem:[%s174_s6] sm:$0xff] (%p864_p3)  ;;  %v189_v5 = vld [vmem:[%s174_s6 + $0x8] sm:$0xff] (%p864_p3)  ;;  %s171_s7 = scalar_lea.vmem (%p864_p3), [#allocation3], %s762_s30 }
  0x18   : > { %v191_v6 = vld [vmem:[%s174_s6 + $0x20] sm:$0xff] (%p864_p3)  ;;  %188 = vst [vmem:[%s171_s7] sm:$0xff] (%p864_p3), %v187_v4  ;;  %v193_v7 = vld [vmem:[%s174_s6 + $0x28] sm:$0xff] (%p864_p3) }
  0x19   : > { %190 = vst [vmem:[%s171_s7 + $0x8] sm:$0xff] %v189_v5  ;;  %v195_v8 = vld [vmem:[%s174_s6 + $0x40] sm:$0xff]  ;;  %v197_v9 = vld [vmem:[%s174_s6 + $0x48] sm:$0xff] }
  0x1a   : > { %192 = vst [vmem:[%s171_s7 + $0x10] sm:$0xff] %v191_v6 }
  0x1b   : > { %194 = vst [vmem:[%s171_s7 + $0x18] sm:$0xff] %v193_v7 }
  0x1c   : > { %196 = vst [vmem:[%s171_s7 + $0x20] sm:$0xff] %v195_v8 }
  0x1d   : > { %198 = vst [vmem:[%s171_s7 + $0x28] sm:$0xff] %v197_v9 }
  0x1e PF: > { %p743_p5 = scmp.ge.s32.totalorder %s813_s14, 1  ;;  %p212_p6 = scmp.lt.s32.totalorder %s813_s14, 3 }
  0x20   : > { %p213_p7 = pnand %p743_p5, %p212_p6 }
  0x21   : > { %s219_s8 = sand.u32 (!%p213_p7), 1, %s805_s12   ;;  %s745_s9 = sshll.u32 (!%p213_p7), %s734_s15, 1 }
  0x22   : > { %216 = sbr.rel (%p213_p7) target bundleno = 254 (0xfe), region = 70  ;;  %s744_s10 = sshll.u32 (!%p213_p7), %s219_s8, 5 }
  0x23   : > { %s763_s11 = smul.u32 (!%p213_p7), 48, %s219_s8  ;;  %p260_p8 = scmp.lt.s32.totalorder (!%p213_p7), %s745_s9, 3 }
  0x24   : > { %s221_s17 = scalar_lea.vmem (!%p213_p7), [#allocation2], %s744_s10 }
  0x25   : > { %s898_s12 = scalar_lea.vmem (!%p213_p7), [#allocation3], %s763_s11 }
  0x27   : > { %v365_v10 = vlaneseq  ;;  %v888_v11 = vld [vmem:[%s221_s17 + $0x18] sm:$0xff]  ;;  %v890_v12 = vld [vmem:[%s221_s17 + $0x10] sm:$0xff]  ;;  %v892_v13 = vld [vmem:[%s221_s17 + $0x8] sm:$0xff]  ;;  %vm303_vm0 = vcmask 1040384   ;;  %s1070_s9 = smov (!%p260_p8, %s745_s9), 3  ;;  %v815_v26 = vmov 0.0  }
  0x28   : > { %420 = vmatpush.msra.mxu1 %v888_v11  ;;  %397 = vmatpush.msra.mxu0 %v890_v12  ;;  %v901_v14 = vld [vmem:[%s898_s12 + $0x8] sm:$0xff]  ;;  %v904_v15 = vld [vmem:[%s898_s12 + $0x18] sm:$0xff]  ;;  %v909_v18 = vld [vmem:[%s898_s12] sm:$0xff]  ;;  %s746_s14 = sshll.u32 %s1070_s9, 1  ;;  %vm376_vm2 = vcmask 130048   ;;  %vm435_vm8 = vcmask 1046528   ;;  %s268_s23 = scalar_lea.vmem %s1064_s3, %s1070_s9 }
  0x29   : > { %v366_v16 = vshrl.u32 %v365_v10, 7  ;;  %v369_v17 = vand.u32 127, %v365_v10  ;;  %v912_v19 = vrot.slane %v901_v14, 7  ;;  %v915_v20 = vrot.slane %v904_v15, 7  ;;  %v918_v21 = vld [vmem:[%s898_s12 + $0x10] sm:$0xff]  ;;  %s263_s20 = scalar_lea.vmem %s1063_s2, %s746_s14 }
  0x2a   : > { %v921_v22 = vrot.slane %v909_v18, 7  ;;  %421 = vmatpush.msra.mxu1 %v892_v13  ;;  %v926_v23 = vrot.slane %v918_v21, 7  ;;  %v940_v28 = vld [vmem:[%s221_s17] sm:$0xff]  ;;  %v959_v37 = vld [vmem:[%s898_s12 + $0x28] sm:$0x1]  ;;  %vm645_vm9 = vcmp.lt.s32.totalorder %v365_v10, 256 }
  0x2b   : > { %vm370_vm1 = vcmp.lt.s32.totalorder %v369_v17, %v366_v16  ;;  %v934_v24 = vsel %vm303_vm0, %v912_v19, %v915_v20  ;;  %v317_v25 = vsub.f32 %v901_v14, %v912_v19  ;;  %v280_v29 = vld [vmem:[%s263_s20] sm:$0xf]  ;;  %398 = vmatpush.msra.mxu0 %v940_v28  ;;  %v321_v38 = vsub.f32 %v959_v37, %v915_v20 }
  0x2c   : > { %v938_v27 = vsel %vm370_vm1, 1.0, %v815_v26  ;;  %v319_v30 = vsub.f32 %v904_v15, %v934_v24  ;;  %v307_v31 = vsel %vm303_vm0, %v921_v22, %v926_v23  ;;  %v316_v32 = vsub.f32 %v909_v18, %v921_v22  ;;  %v953_v33 = vld [vmem:[%s898_s12 + $0x20] sm:$0x1] }
  0x2d   : > { %752 = vmatmul.msk.f32.vlgmr.msra.gmra.mxu1 %vm376_vm2, %v938_v27  ;;  %v282_v34 = vrot.slane %v280_v29, 7  ;;  %v318_v35 = vsub.f32 %v918_v21, %v307_v31  ;;  %v320_v36 = vsub.f32 %v953_v33, %v926_v23  ;;  %750 = vmatmul.msk.f32.vlgmr.msra.gmra.mxu0 %vm376_vm2, %v938_v27  ;;  %v367_v40 = vadd.s32 8, %v366_v16 }
  0x2e   : > { %v337_v45 = vadd.f32 %v307_v31, %v918_v21  ;;  %v339_v46 = vadd.f32 %v926_v23, %v953_v33  ;;  %v347_v49 = vperm.slane %v280_v29, 0  ;;  %v338_v50 = vadd.f32 %v934_v24, %v904_v15 }
  0x2f   : > { %v284_v39 = vsub.f32 %v280_v29, %v282_v34  ;;  %vm371_vm3 = vcmp.lt.s32.totalorder %v369_v17, %v367_v40  ;;  %v340_v51 = vadd.f32 %v915_v20, %v959_v37  ;;  %v348_v52 = vperm.slane %v280_v29, 2 }
  0x30   : > { %v965_v42 = vsel %vm371_vm3, 1.0, %v815_v26  ;;  %v335_v55 = vadd.f32 %v921_v22, %v909_v18  ;;  %v336_v56 = vadd.f32 %v912_v19, %v901_v14  ;;  %v343_v58 = vmul.f32 0.5, %v337_v45 }
  0x31   : > { %789 = vrcp.f32 %v284_v39  ;;  %v296_v44 = vand.u32 2147483648, %v284_v39  ;;  %vm290_vm4 = vweird.f32 %v284_v39  ;;  %v294_v48 = vand.u32 2147483647, %v284_v39 }
  0x32   : > { %v345_v59 = vmul.f32 0.5, %v339_v46  ;;  %v351_v60 = vperm.slane %v347_v49, 0  ;;  %v344_v61 = vmul.f32 0.5, %v338_v50  ;;  %v346_v62 = vmul.f32 0.5, %v340_v51 }
  0x33   : > { %v297_v54 = vor.u32 1.1754944e-38, %v296_v44  ;;  %vm295_vm7 = vcmp.eq.f32.partialorder %v294_v48, 8.507059e+37  ;;  %v352_v63 = vperm.slane %v348_v52, 0  ;;  %v341_v2 = vmul.f32 0.5, %v335_v55 }
  0x34   : > { %v342_v3 = vmul.f32 0.5, %v336_v56  ;;  %v355_v6 = vsub.f32 %v343_v58, %v351_v60  ;;  %v357_v7 = vsub.f32 %v345_v59, %v351_v60 }
  0x35   : > { %753 = vmatmul.msk.f32.gmra.mxu1 %vm376_vm2, %v965_v42  ;;  %751 = vmatmul.msk.f32.gmra.mxu0 %vm376_vm2, %v965_v42  ;;  %v356_v8 = vsub.f32 %v344_v61, %v352_v63  ;;  %v358_v9 = vsub.f32 %v346_v62, %v352_v63  ;;  %v353_v17 = vsub.f32 %v341_v2, %v351_v60 }
  0x36   : > { %v354_v18 = vsub.f32 %v342_v3, %v352_v63 }
  0x37   : > { %v790_v41 = vpop.eup %789 }
  0x38   : > { %v286_v43 = vmul.f32 %v790_v41, %v284_v39  ;;  %vm291_vm5 = vweird.f32 %v790_v41 }
  0x39   : > { %vm292_vm6 = vmor %vm290_vm4, %vm291_vm5 }
  0x3a   : > { %v287_v47 = vsub.f32 1.0, %v286_v43 }
  0x3c   : > { %v288_v53 = vmul.f32 %v790_v41, %v287_v47 }
  0x3e   : > { %v289_v57 = vadd.f32 %v790_v41, %v288_v53 }
  0x40   : > { %v293_v0 = vsel %vm292_vm6, %v790_v41, %v289_v57 }
  0x41   : > { %v298_v1 = vsel %vm295_vm7, %v297_v54, %v293_v0 }
  0x42   : > { %v324_v4 = vperm.slane %v298_v1, 3  ;;  %v323_v5 = vperm.slane %v298_v1, 1 }
  0x44   : > { %v328_v15 = vperm.slane %v324_v4, 1  ;;  %v327_v16 = vperm.slane %v323_v5, 1 }
  0x46   : > { %v330_v21 = vmul.f32 %v328_v15, %v317_v25  ;;  %v332_v22 = vmul.f32 %v328_v15, %v319_v30  ;;  %v329_v24 = vmul.f32 %v327_v16, %v316_v32  ;;  %v331_v26 = vmul.f32 %v327_v16, %v318_v35 }
  0x47   : > { %v985_v29 = vmul.f32 %v355_v6, %v327_v16  ;;  %v987_v31 = vmul.f32 %v357_v7, %v327_v16  ;;  %v989_v34 = vmul.f32 %v356_v8, %v328_v15  ;;  %v991_v39 = vmul.f32 %v358_v9, %v328_v15 }
  0x48   : > { %v559_v40 = vrot.slane %v330_v21, 1  ;;  %v560_v41 = vrot.slane %v332_v22, 1  ;;  %v556_v43 = vrot.slane %v329_v24, 1  ;;  %v557_v44 = vrot.slane %v331_v26, 1 }
  0x49   : > { %v437_v45 = vrot.slane %v985_v29, 1  ;;  %v442_v14 = vrot.slane %v987_v31, 1  ;;  %v440_v19 = vrot.slane %v989_v34, 1  ;;  %v444_v25 = vrot.slane %v991_v39, 1 }
  0x4a   : > { %v561_v30 = vsel %vm435_vm8, %v559_v40, %v560_v41  ;;  %v558_v32 = vsel %vm435_vm8, %v556_v43, %v557_v44  ;;  %v359_v35 = vmul.f32 %v353_v17, %v327_v16  ;;  %v360_v46 = vmul.f32 %v354_v18, %v328_v15 }
  0x4b   : > { %v443_v47 = vsel %vm435_vm8, %v437_v45, %v442_v14  ;;  %v445_v48 = vsel %vm435_vm8, %v440_v19, %v444_v25  ;;  %v333_v57 = vmul.f32 %v327_v16, %v320_v36  ;;  %v570_v58 = vmul.f32 %v558_v32, %v940_v28 }
  0x4c   : > { %v452_v49 = vmul.f32 %v443_v47, %v890_v12  ;;  %v453_v50 = vmul.f32 %v445_v48, %v888_v11  ;;  %v436_v51 = vrot.slane %v359_v35, 1  ;;  %v439_v52 = vrot.slane %v360_v46, 1 }
  0x4d   : > { %v334_v59 = vmul.f32 %v328_v15, %v321_v38  ;;  %v571_v60 = vmul.f32 %v561_v30, %v892_v13  ;;  %v562_v61 = vrot.slane %v333_v57, 1  ;;  %v574_v63 = vmul.f32 0.33333334, %v570_v58 }
  0x4e   : > { %468 = vmatpush.msra.mxu2 %v452_v49  ;;  %491 = vmatpush.msra.mxu3 %v453_v50  ;;  %v438_v53 = vsel %vm435_vm8, %v436_v51, %v437_v45  ;;  %v441_v54 = vsel %vm435_vm8, %v439_v52, %v440_v19 }
  0x4f   : > { %v450_v55 = vmul.f32 %v438_v53, %v940_v28  ;;  %v451_v56 = vmul.f32 %v441_v54, %v892_v13  ;;  %v563_v62 = vsel %vm435_vm8, %v557_v44, %v562_v61  ;;  %v575_v1 = vmul.f32 0.33333334, %v571_v60 }
  0x50   : > { %v572_v0 = vmul.f32 %v563_v62, %v890_v12  ;;  %v582_v2 = vrot.slane %v574_v63, 7 }
  0x51   : > { %469 = vmatpush.msra.mxu2 %v450_v55  ;;  %492 = vmatpush.msra.mxu3 %v451_v56  ;;  %v583_v20 = vrot.slane %v575_v1, 7 }
  0x52   : > { %754 = vmatmul.msk.f32.vlgmr.msra.gmra.mxu2 %vm376_vm2, %v938_v27  ;;  %756 = vmatmul.msk.f32.vlgmr.msra.gmra.mxu3 %vm376_vm2, %v938_v27  ;;  %v564_v27 = vrot.slane %v334_v59, 1  ;;  %v576_v33 = vmul.f32 0.33333334, %v572_v0 }
  0x54   : > { %v584_v3 = vrot.slane %v576_v33, 7 }
  0x56   : > { %v585_v38 = vsel %vm303_vm0, %v582_v2, %v584_v3 }
  0x5a   : > { %755 = vmatmul.msk.f32.gmra.mxu2 %vm376_vm2, %v965_v42  ;;  %757 = vmatmul.msk.f32.gmra.mxu3 %vm376_vm2, %v965_v42  ;;  %v565_v42 = vsel %vm435_vm8, %v560_v41, %v564_v27 }
  0x5b   : > { %v573_v23 = vmul.f32 %v565_v42, %v888_v11 }
  0x5d   : > { %v577_v36 = vmul.f32 0.33333334, %v573_v23 }
  0x5f   : > { %v586_v37 = vrot.slane %v577_v36, 7 }
  0x61   : > { %v587_v4 = vsel %vm303_vm0, %v583_v20, %v586_v37 }
  0xaa   : > { %v423_v5 = vpop.f32.mrf.mxu1  ;;  %v400_v6 = vpop.f32.mrf.mxu0 }
  0xab   : > { %v505_v7 = vrot.slane %v423_v5, 7  ;;  %v504_v8 = vrot.slane %v400_v6, 7 }
  0xad   : > { %v517_v18 = vmul.f32 %v505_v7, %v360_v46  ;;  %v516_v21 = vmul.f32 %v504_v8, %v359_v35 }
  0xb2   : > { %v426_v9 = vpop.f32.mrf.mxu1  ;;  %v403_v15 = vpop.f32.mrf.mxu0 }
  0xb3   : > { %v508_v26 = vrot.slane %v426_v9, 7  ;;  %v506_v40 = vrot.slane %v403_v15, 7 }
  0xb5   : > { %v509_v44 = vsel %vm303_vm0, %v505_v7, %v508_v26  ;;  %v521_v45 = vmul.f32 %v508_v26, %v991_v39  ;;  %v507_v14 = vsel %vm303_vm0, %v504_v8, %v506_v40  ;;  %v520_v19 = vmul.f32 %v506_v40, %v987_v31 }
  0xb6   : > { %v519_v35 = vmul.f32 %v509_v44, %v989_v34  ;;  %v518_v46 = vmul.f32 %v507_v14, %v985_v29 }
  0xd5   : > { %v471_v16 = vpop.f32.mrf.mxu2  ;;  %v494_v17 = vpop.f32.mrf.mxu3 }
  0xd6   : > { %v526_v22 = vrot.slane %v471_v16, 7  ;;  %v527_v24 = vrot.slane %v494_v17, 7 }
  0xd8   : > { %v538_v41 = vsub.f32 %v516_v21, %v526_v22  ;;  %v539_v43 = vsub.f32 %v517_v18, %v527_v24 }
  0xda   : > { %v544_v48 = vmul.f32 2.0, %v538_v41  ;;  %v545_v49 = vmul.f32 2.0, %v539_v43 }
  0xdc   : > { %v594_v56 = vadd.f32 %v582_v2, %v544_v48  ;;  %v595_v57 = vadd.f32 %v583_v20, %v545_v49 }
  0xdd   : > { %v474_v25 = vpop.f32.mrf.mxu2  ;;  %v497_v30 = vpop.f32.mrf.mxu3 }
  0xde   : > { %v528_v32 = vrot.slane %v474_v25, 7  ;;  %v530_v47 = vrot.slane %v497_v30, 7  ;;  %v606_v63 = vrot.slane %v594_v56, 1  ;;  %v609_v0 = vrot.slane %v595_v57, 1 }
  0xe0   : > { %v529_v50 = vsel %vm303_vm0, %v526_v22, %v528_v32  ;;  %v542_v51 = vsub.f32 %v520_v19, %v528_v32  ;;  %v531_v52 = vsel %vm303_vm0, %v527_v24, %v530_v47  ;;  %v543_v39 = vsub.f32 %v521_v45, %v530_v47 }
  0xe1   : > { %v540_v53 = vsub.f32 %v518_v46, %v529_v50  ;;  %v541_v54 = vsub.f32 %v519_v35, %v531_v52 }
  0xe2   : > { %v548_v55 = vmul.f32 2.0, %v542_v51  ;;  %v549_v31 = vmul.f32 2.0, %v543_v39 }
  0xe3   : > { %v546_v58 = vmul.f32 2.0, %v540_v53  ;;  %v547_v59 = vmul.f32 2.0, %v541_v54 }
  0xe4   : > { %v598_v60 = vadd.f32 %v584_v3, %v548_v55  ;;  %v599_v34 = vadd.f32 %v586_v37, %v549_v31 }
  0xe5   : > { %v596_v61 = vadd.f32 %v585_v38, %v546_v58  ;;  %v597_v29 = vadd.f32 %v587_v4, %v547_v59 }
  0xe6   : > { %v612_v27 = vrot.slane %v598_v60, 1  ;;  %v614_v62 = vrot.slane %v599_v34, 1 }
  0xe7   : > { %v607_v42 = vrot.slane %v596_v61, 1  ;;  %v610_v1 = vrot.slane %v597_v29, 1 }
  0xe9   : > { %v608_v23 = vsel %vm435_vm8, %v606_v63, %v607_v42  ;;  %v613_v33 = vsel %vm435_vm8, %v607_v42, %v612_v27  ;;  %v611_v36 = vsel %vm435_vm8, %v609_v0, %v610_v1  ;;  %v615_v2 = vsel %vm435_vm8, %v610_v1, %v614_v62 }
  0xea   : > { %v620_v20 = vmul.f32 %v608_v23, %v940_v28  ;;  %v622_v3 = vmul.f32 %v613_v33, %v890_v12  ;;  %v621_v37 = vmul.f32 %v611_v36, %v892_v13  ;;  %v623_v38 = vmul.f32 %v615_v2, %v888_v11 }
  0xec   : > { %v624_v4 = vadd.f32 %v622_v3, %v620_v20  ;;  %v631_v5 = vadd.f32 %v623_v38, %v621_v37 }
  0xee   : > { %v625_v6 = vrot.slane %v624_v4, 4  ;;  %v632_v7 = vrot.slane %v631_v5, 4 }
  0xf0   : > { %v626_v8 = vadd.f32 %v625_v6, %v624_v4  ;;  %v633_v9 = vadd.f32 %v632_v7, %v631_v5 }
  0xf2   : > { %v627_v15 = vrot.slane %v626_v8, 2  ;;  %v634_v16 = vrot.slane %v633_v9, 2 }
  0xf4   : > { %v628_v17 = vadd.f32 %v627_v15, %v626_v8  ;;  %v635_v18 = vadd.f32 %v634_v16, %v633_v9 }
  0xf6   : > { %v629_v21 = vrot.slane %v628_v17, 1  ;;  %v636_v22 = vrot.slane %v635_v18, 1 }
  0xf8   : > { %v637_v28 = vadd.f32 %v636_v22, %v635_v18  ;;  %v630_v12 = vadd.f32 %v629_v21, %v628_v17 }
  0xfa   : > { %v640_v11 = vrot.slane %v637_v28, 7 }
  0xfc   : > { %v641_v13 = vsel %vm303_vm0, %v630_v12, %v640_v11 }
  0xfd   : > { %647 = vst.msk [vmem:[%s268_s23] sm:$0x3] %vm645_vm9, %v641_v13 }
  0xfe PF: > { %p10_p9 = scmp.ge.s32.totalorder %s853_s16, 4   ;;  %s1066_s12 = smov %s809_s13 }
  0xff   : > { %s1067_s13 = smov %s862_s19  ;;  %s1068_s14 = smov %s853_s16 }
 0x100   :  { %12 = sbr.rel (!%p10_p9) target bundleno = 2 (0x2), region = 124 }

</bundles_post_ra>
